<compile_context>
chip_gen: v6e
topology: v6e:2x2x1
jax: 0.10.0
libtpu: 0.0.40
codegen_flags: <defaults>
</compile_context>

<pallas_src>
import functools

import jax
import jax.numpy as jnp
from jax import lax
from jax.experimental import pallas as pl
from jax.experimental.pallas import tpu as pltpu


# ---------------------------------------------------------------------------
# Fused Pallas kernel: branch FNN + trunk FNN + dot-product combine
# ---------------------------------------------------------------------------
def _deeponet_fused_kernel(x_func_ref, x_loc_ref, *rest, n_branch, n_trunk):
    """rest = branch (w,b)*n_branch refs, trunk (w,b)*n_trunk refs, bias_ref, out_ref."""
    branch_refs = rest[: 2 * n_branch]
    trunk_refs = rest[2 * n_branch : 2 * (n_branch + n_trunk)]
    bias_ref = rest[-2]   # (1,) scalar in SMEM
    out_ref = rest[-1]    # (B, N) in VMEM

    def fnn(x, param_refs, n_layers):
        # Linear -> tanh for all layers except the last (plain Linear), as in FNN.
        for i in range(n_layers):
            w = param_refs[2 * i][...]        # (in, out)
            b = param_refs[2 * i + 1][...]    # (1, out) -> broadcasts over rows
            x = jnp.dot(x, w, preferred_element_type=jnp.float32) + b
            if i < n_layers - 1:
                x = jnp.tanh(x)               # EUP transcendental (free slot vs MXU)
        return x

    bf = fnn(x_func_ref[...], branch_refs, n_branch)   # (B, p)
    tf = fnn(x_loc_ref[...], trunk_refs, n_trunk)      # (N, p)

    # einsum('bi,ni->bn'): contract dim 1 of both operands, no explicit transpose.
    out = lax.dot_general(
        bf, tf,
        dimension_numbers=(((1,), (1,)), ((), ())),
        preferred_element_type=jnp.float32,
    )
    out_ref[...] = out + bias_ref[0]


# ---------------------------------------------------------------------------
# Wrapper
# ---------------------------------------------------------------------------
def deeponet_forward(x, branch_params, trunk_params, b):
    """x = (x_func, (x_loc,))  ->  (B, N), matching the PyTorch forward."""
    x_func = x[0]                 # (B, m)
    x_loc = x[1][0]               # (N, d)
    B, m = x_func.shape
    N, d = x_loc.shape
    n_branch = len(branch_params)
    n_trunk = len(trunk_params)

    flat_inputs = [x_func, x_loc]
    in_specs = [
        pl.BlockSpec((B, m), lambda: (0, 0)),
        pl.BlockSpec((N, d), lambda: (0, 0)),
    ]
    # Weights / biases: full-array VMEM blocks, resident for the whole call.
    for w, bias in list(branch_params) + list(trunk_params):
        flat_inputs.append(w)
        flat_inputs.append(bias.reshape(1, -1))
        in_specs.append(pl.BlockSpec(w.shape, lambda: (0, 0)))
        in_specs.append(pl.BlockSpec((1, bias.shape[0]), lambda: (0, 0)))
    # Scalar combine bias b in SMEM.
    flat_inputs.append(b)
    in_specs.append(pl.BlockSpec(memory_space=pltpu.SMEM))

    kernel = functools.partial(
        _deeponet_fused_kernel, n_branch=n_branch, n_trunk=n_trunk
    )
    return pl.pallas_call(
        kernel,
        out_shape=jax.ShapeDtypeStruct((B, N), jnp.float32),
        in_specs=in_specs,
        out_specs=pl.BlockSpec((B, N), lambda: (0, 0)),
        compiler_params=pltpu.CompilerParams(vmem_limit_bytes=64 << 20),
    )(*flat_inputs)


# ---------------------------------------------------------------------------
# Deterministic parameter init (synthetic; no checkpoint loading)
# ---------------------------------------------------------------------------
def init_fnn_params(key, layer_sizes):
    params = []
    for i in range(len(layer_sizes) - 1):
        key, kw, kb = jax.random.split(key, 3)
        fan_in, fan_out = layer_sizes[i], layer_sizes[i + 1]
        w = jax.random.normal(kw, (fan_in, fan_out), jnp.float32) * (1.0 / jnp.sqrt(fan_in))
        bias = jax.random.normal(kb, (fan_out,), jnp.float32) * 0.01
        params.append((w, bias))
    return params


# ---------------------------------------------------------------------------
# Main
# ---------------------------------------------------------------------------
if __name__ == "__main__":
    key = jax.random.PRNGKey(0)

    # DeepONet(branch_layers, trunk_layers, activation_type='tanh')
    # Lane-dense hidden / latent widths (128) so layer outputs and the final
    # (B, N) store are full-lane (no masked vst).
    branch_layers = [16, 128, 128]   # sensor dim m=16 -> hidden 128 -> latent p=128
    trunk_layers = [2, 128, 128]     # coordinate dim d=2 -> hidden 128 -> latent p=128

    k1, k2, k3, k4 = jax.random.split(key, 4)
    branch_params = init_fnn_params(k1, branch_layers)
    trunk_params = init_fnn_params(k2, trunk_layers)
    b_param = jnp.zeros((1,), jnp.float32)  # scalar Parameter b (init 0.0)

    B, N = 8, 128  # batch of functions, number of query locations
    x_func = jax.random.normal(k3, (B, branch_layers[0]), jnp.float32)
    x_loc = jax.random.normal(k4, (N, trunk_layers[0]), jnp.float32)

    out = deeponet_forward((x_func, (x_loc,)), branch_params, trunk_params, b_param)
    out = jax.block_until_ready(out)

    # Pure-JAX reference check of the same forward pass.
    def ref_fnn(x, params):
        for i, (w, bias) in enumerate(params):
            x = x @ w + bias
            if i < len(params) - 1:
                x = jnp.tanh(x)
        return x

    ref = jnp.einsum(
        "bi,ni->bn", ref_fnn(x_func, branch_params), ref_fnn(x_loc, trunk_params)
    ) + b_param[0]
    assert out.shape == (B, N)
    assert jnp.allclose(out, ref, atol=1e-3, rtol=1e-3)

    print("KERNEL_OK")
</pallas_src>

<mosaic_0001>
module attributes {stable_mosaic.version = 11 : i64} {
  func.func @_deeponet_fused_kernel(%arg0: memref<8x16xf32, #tpu.memory_space<vmem>>, %arg1: memref<128x2xf32, #tpu.memory_space<vmem>>, %arg2: memref<16x128xf32, #tpu.memory_space<vmem>>, %arg3: memref<1x128xf32, #tpu.memory_space<vmem>>, %arg4: memref<128x128xf32, #tpu.memory_space<vmem>>, %arg5: memref<1x128xf32, #tpu.memory_space<vmem>>, %arg6: memref<2x128xf32, #tpu.memory_space<vmem>>, %arg7: memref<1x128xf32, #tpu.memory_space<vmem>>, %arg8: memref<128x128xf32, #tpu.memory_space<vmem>>, %arg9: memref<1x128xf32, #tpu.memory_space<vmem>>, %arg10: memref<1xf32, #tpu.memory_space<smem>>, %arg11: memref<8x128xf32, #tpu.memory_space<vmem>>) attributes {dimension_semantics = [], scalar_prefetch = 0 : i64, scratch_operands = 0 : i64, tpu.core_type = #tpu.core_type<tc>} {
    %c0 = arith.constant 0 : index
    %c0_0 = arith.constant 0 : index
    %0 = vector.load %arg0[%c0, %c0_0] : memref<8x16xf32, #tpu.memory_space<vmem>>, vector<8x16xf32>
    %c0_1 = arith.constant 0 : index
    %c0_2 = arith.constant 0 : index
    %1 = vector.load %arg2[%c0_1, %c0_2] : memref<16x128xf32, #tpu.memory_space<vmem>>, vector<16x128xf32>
    %c0_3 = arith.constant 0 : index
    %c0_4 = arith.constant 0 : index
    %2 = vector.load %arg3[%c0_3, %c0_4] : memref<1x128xf32, #tpu.memory_space<vmem>>, vector<1x128xf32>
    %cst = arith.constant dense<0.000000e+00> : vector<8x128xf32>
    %3 = tpu.matmul %0, %1, %cst {dimension_numbers = #tpu.dot_dimension_numbers<[1], [0], [0], [1], [0, 0, 1, 1], [], []>} : vector<8x16xf32>, vector<16x128xf32>, vector<8x128xf32> -> vector<8x128xf32>
    %4 = vector.broadcast %2 : vector<1x128xf32> to vector<8x128xf32>
    %5 = arith.addf %3, %4 : vector<8x128xf32>
    %6 = math.tanh %5 : vector<8x128xf32>
    %c0_5 = arith.constant 0 : index
    %c0_6 = arith.constant 0 : index
    %7 = vector.load %arg4[%c0_5, %c0_6] : memref<128x128xf32, #tpu.memory_space<vmem>>, vector<128x128xf32>
    %c0_7 = arith.constant 0 : index
    %c0_8 = arith.constant 0 : index
    %8 = vector.load %arg5[%c0_7, %c0_8] : memref<1x128xf32, #tpu.memory_space<vmem>>, vector<1x128xf32>
    %cst_9 = arith.constant dense<0.000000e+00> : vector<8x128xf32>
    %9 = tpu.matmul %6, %7, %cst_9 {dimension_numbers = #tpu.dot_dimension_numbers<[1], [0], [0], [1], [0, 0, 1, 1], [], []>} : vector<8x128xf32>, vector<128x128xf32>, vector<8x128xf32> -> vector<8x128xf32>
    %10 = vector.broadcast %8 : vector<1x128xf32> to vector<8x128xf32>
    %11 = arith.addf %9, %10 : vector<8x128xf32>
    %c0_10 = arith.constant 0 : index
    %c0_11 = arith.constant 0 : index
    %12 = vector.load %arg1[%c0_10, %c0_11] : memref<128x2xf32, #tpu.memory_space<vmem>>, vector<128x2xf32>
    %c0_12 = arith.constant 0 : index
    %c0_13 = arith.constant 0 : index
    %13 = vector.load %arg6[%c0_12, %c0_13] : memref<2x128xf32, #tpu.memory_space<vmem>>, vector<2x128xf32>
    %c0_14 = arith.constant 0 : index
    %c0_15 = arith.constant 0 : index
    %14 = vector.load %arg7[%c0_14, %c0_15] : memref<1x128xf32, #tpu.memory_space<vmem>>, vector<1x128xf32>
    %cst_16 = arith.constant dense<0.000000e+00> : vector<128x128xf32>
    %15 = tpu.matmul %12, %13, %cst_16 {dimension_numbers = #tpu.dot_dimension_numbers<[1], [0], [0], [1], [0, 0, 1, 1], [], []>} : vector<128x2xf32>, vector<2x128xf32>, vector<128x128xf32> -> vector<128x128xf32>
    %16 = vector.broadcast %14 : vector<1x128xf32> to vector<128x128xf32>
    %17 = arith.addf %15, %16 : vector<128x128xf32>
    %18 = math.tanh %17 : vector<128x128xf32>
    %c0_17 = arith.constant 0 : index
    %c0_18 = arith.constant 0 : index
    %19 = vector.load %arg8[%c0_17, %c0_18] : memref<128x128xf32, #tpu.memory_space<vmem>>, vector<128x128xf32>
    %c0_19 = arith.constant 0 : index
    %c0_20 = arith.constant 0 : index
    %20 = vector.load %arg9[%c0_19, %c0_20] : memref<1x128xf32, #tpu.memory_space<vmem>>, vector<1x128xf32>
    %cst_21 = arith.constant dense<0.000000e+00> : vector<128x128xf32>
    %21 = tpu.matmul %18, %19, %cst_21 {dimension_numbers = #tpu.dot_dimension_numbers<[1], [0], [0], [1], [0, 0, 1, 1], [], []>} : vector<128x128xf32>, vector<128x128xf32>, vector<128x128xf32> -> vector<128x128xf32>
    %22 = vector.broadcast %20 : vector<1x128xf32> to vector<128x128xf32>
    %23 = arith.addf %21, %22 : vector<128x128xf32>
    %cst_22 = arith.constant dense<0.000000e+00> : vector<8x128xf32>
    %24 = tpu.matmul %11, %23, %cst_22 {dimension_numbers = #tpu.dot_dimension_numbers<[1], [1], [0], [0], [0, 0, 1, 0], [], []>} : vector<8x128xf32>, vector<128x128xf32>, vector<8x128xf32> -> vector<8x128xf32>
    %c0_23 = arith.constant 0 : index
    %25 = memref.load %arg10[%c0_23] : memref<1xf32, #tpu.memory_space<smem>>
    %26 = vector.broadcast %25 : f32 to vector<8x128xf32>
    %27 = arith.addf %24, %26 : vector<8x128xf32>
    %c0_24 = arith.constant 0 : index
    %c0_25 = arith.constant 0 : index
    %28 = vector.load %arg11[%c0_24, %c0_25] : memref<8x128xf32, #tpu.memory_space<vmem>>, vector<8x128xf32>
    tpu.vector_store %arg11[%c0_24, %c0_25], %27 {strides = array<i32>} : memref<8x128xf32, #tpu.memory_space<vmem>>, vector<8x128xf32>,
    return
  }
}

</mosaic_0001>

<bundles_post_ra>
// kernel: tpu_custom_call.1
= control target key start
LH: loop header
LB: loop body
LE: loop exit
PB: predicated region body
PF: predicated region fallthrough
CT: control target
= control target key end

     0   :  { %17 = vsyncpa [#allocation4], 0  ;;  %s1385_s0 = inlined_call_operand.vmem [shape: f32[8,16], index: 0, kind: input, shape index: {}]   ;;  %s1386_s1 = inlined_call_operand.vmem [shape: f32[128,2], index: 1, kind: input, shape index: {}]   ;;  %s1387_s2 = inlined_call_operand.hbm [shape: f32[16,128], index: 2, kind: input, shape index: {}]   ;;  %s1388_s3 = inlined_call_operand.vmem [shape: f32[1,128], index: 3, kind: input, shape index: {}]   ;;  %s1389_s4 = inlined_call_operand.vmem [shape: f32[128,128], index: 4, kind: input, shape index: {}]   ;;  %s1390_s5 = inlined_call_operand.vmem [shape: f32[1,128], index: 5, kind: input, shape index: {}]   ;;  %s1391_s6 = inlined_call_operand.vmem [shape: f32[2,128], index: 6, kind: input, shape index: {}]   ;;  %s1392_s7 = inlined_call_operand.vmem [shape: f32[1,128], index: 7, kind: input, shape index: {}]   ;;  %s1393_s8 = inlined_call_operand.hbm [shape: f32[128,128], index: 8, kind: input, shape index: {}]   ;;  %s1394_s9 = inlined_call_operand.vmem [shape: f32[1,128], index: 9, kind: input, shape index: {}]   ;;  %s1395_s10 = inlined_call_operand.<no memory space> [shape: f32[1], index: 10, kind: input, shape index: {}]   ;;  %s1396_s11 = inlined_call_operand.hbm [shape: f32[8,128], index: 11, kind: output, shape index: {}]  }
   0x1   :  { %18 = vsyncpa [#allocation7], 0 }
   0x2   :  { %19 = vsyncpa [#allocation5], 0  ;;  %s1115_s17 = smov [#allocation3]  }
   0x3   :  { %s29_s18 = sshll.u32 %s1115_s17, 4  ;;  %s30_s18 = int_to_ptr.vmem [resolvable:$true] %s29_s18 }
   0x4   :  { %s1057_s19 = scalar_lea.vmem %s30_s18, 256  ;;  %p1062_p1 = scmp.lt.s32.totalorder %s30_s18, %s30_s18 }
   0x5   :  { %p1058_p0 = scmp.ne.s32.totalorder %s30_s18, %s1057_s19  ;;  %p1063_p2 = scmp.lt.s32.totalorder %s1057_s19, %s1057_s19 }
   0x7   :  { %p1064_p3 = por %p1063_p2, %p1062_p1 }
   0x9   :  { %p1065_p4 = pnand %p1064_p3, %p1058_p0 }
   0xb   :  { %1068 = shalt.err (!%p1065_p4)
}
   0xc   :  { %s1116_s20 = smov 128   ;;  %s1117_s21 = smov 8  }
   0xd   :  { %35 = dma.hbm_to_vmem [thread:$0]  %s1387_s2, 256, %s30_s18, [#allocation4], %s1116_s20, %s1116_s20, %s1117_s21  }
   0xe   :  { %s1118_s24 = smov [#allocation6]  }
   0xf   :  { %s51_s25 = sshll.u32 %s1118_s24, 4  ;;  %s52_s25 = int_to_ptr.vmem [resolvable:$true] %s51_s25 }
  0x10   :  { %s1077_s26 = scalar_lea.vmem %s52_s25, 2048  ;;  %p1082_p6 = scmp.lt.s32.totalorder %s52_s25, %s52_s25 }
  0x11   :  { %p1078_p5 = scmp.ne.s32.totalorder %s52_s25, %s1077_s26  ;;  %p1083_p7 = scmp.lt.s32.totalorder %s1077_s26, %s1077_s26 }
  0x13   :  { %p1084_p8 = por %p1083_p7, %p1082_p6 }
  0x15   :  { %p1085_p9 = pnand %p1084_p8, %p1078_p5 }
  0x17   :  { %1088 = shalt.err (!%p1085_p9)
}
  0x18   :  { %57 = dma.hbm_to_vmem [thread:$0]  %s1393_s8, 2048, %s52_s25, [#allocation7], %s1116_s20, %s1116_s20, %s1117_s21  }
  0x19   :  { %1109 = dma.done.wait [#allocation4], 256  }
  0x1a   :  { %1110 = vsyncadd [#allocation4], 4294967040 }
  0x1b   :  { %1111 = dma.done.wait [#allocation7], 2048  }
  0x1c   :  { %1112 = vsyncadd [#allocation7], 4294965248  ;;  %v1119_v0 = vmov 0.0   ;;  %vm1120_vm0 = vmmov 0   ;;  %v70_v1 = vld [vmem:[#allocation3 + $0x8] sm:$0xff]  ;;  %v69_v2 = vld [vmem:[#allocation3] sm:$0xff] }
  0x1d   :  { %849 = vmatprep.subr.mxu0 %v1119_v0  ;;  %853 = vmatprep.mubr.msk.f32.mxu0 %vm1120_vm0, %v1119_v0  ;;  %v68_v3 = vld [vmem:[%s1385_s0] sm:$0xff]  ;;  %vm78_vm1 = vcmask 130048   ;;  %vm319_vm2 = vcmask 1041408   ;;  %vm270_vm3 = vcmask 15360   ;;  %v247_v6 = vld [vmem:[%s1386_s1 + $0x8] sm:$0xff]  ;;  %v248_v7 = vld [vmem:[%s1386_s1 + $0x10] sm:$0xff] }
  0x1e   :  { %856 = vmatprep.subr.mxu1 %v1119_v0  ;;  %888 = vmatprep.mubr.msk.f32.mxu1 %vm1120_vm0, %v1119_v0  ;;  %v262_v4 = vld [vmem:[%s1391_s6] sm:$0x3]  ;;  %v168_v8 = vld [vmem:[%s1389_s4 + $0x78] sm:$0xff]  ;;  %v167_v9 = vld [vmem:[%s1389_s4 + $0x70] sm:$0xff]  ;;  %s1121_s12 = smov [#allocation8]  }
  0x1f   :  { %850 = vmatpush3.msra.mxu0 %v70_v1  ;;  %v246_v5 = vld [vmem:[%s1386_s1] sm:$0xff]  ;;  %857 = vmatpush3.msra.mxu1 %v168_v8  ;;  %v166_v10 = vld [vmem:[%s1389_s4 + $0x68] sm:$0xff]  ;;  %v249_v12 = vld [vmem:[%s1386_s1 + $0x18] sm:$0xff]  ;;  %s731_s13 = sshll.u32 %s1121_s12, 4  ;;  %s732_s13 = int_to_ptr.vmem [resolvable:$true] %s731_s13 }
  0x20   :  { %851 = vmatprep.subr.mxu0 %v1119_v0  ;;  %858 = vmatprep.subr.mxu1 %v1119_v0  ;;  %v499_v11 = vld [vmem:[#allocation6 + $0x78] sm:$0xff]  ;;  %v250_v13 = vld [vmem:[%s1386_s1 + $0x20] sm:$0xff]  ;;  %v164_v16 = vld [vmem:[%s1389_s4 + $0x58] sm:$0xff]  ;;  %s1089_s0 = scalar_lea.vmem %s732_s13, 128  ;;  %p1094_p11 = scmp.lt.s32.totalorder %s732_s13, %s732_s13 }
  0x21   :  { %852 = vmatpush3.msra.mxu0 %v69_v2  ;;  %859 = vmatpush3.msra.mxu1 %v167_v9  ;;  %v165_v14 = vld [vmem:[%s1389_s4 + $0x60] sm:$0xff]  ;;  %v251_v17 = vld [vmem:[%s1386_s1 + $0x28] sm:$0xff]  ;;  %v252_v18 = vld [vmem:[%s1386_s1 + $0x30] sm:$0xff]  ;;  %p1090_p10 = scmp.ne.s32.totalorder %s732_s13, %s1089_s0  ;;  %p1095_p12 = scmp.lt.s32.totalorder %s1089_s0, %s1089_s0 }
  0x22   :  { %854 = vmatmul.mubr.msk.f32.vlgmr.msra.gmra.mxu0 %vm78_vm1, %v68_v3  ;;  %891 = vmatprep.subr.msk.mxu0 %vm319_vm2, %v262_v4  ;;  %v498_v15 = vld [vmem:[#allocation6 + $0x70] sm:$0xff]  ;;  %v163_v19 = vld [vmem:[%s1389_s4 + $0x50] sm:$0xff]  ;;  %v497_v20 = vld [vmem:[#allocation6 + $0x68] sm:$0xff] }
  0x23   :  { %892 = vmatpush3.msk.msra.mxu0 %vm319_vm2, %v262_v4  ;;  %893 = vmatprep.mubr.msk.f32.mxu0 %vm270_vm3, %v246_v5  ;;  %v162_v21 = vld [vmem:[%s1389_s4 + $0x48] sm:$0xff]  ;;  %v253_v22 = vld [vmem:[%s1386_s1 + $0x38] sm:$0xff]  ;;  %v496_v23 = vld [vmem:[#allocation6 + $0x60] sm:$0xff]  ;;  %p1096_p13 = por %p1095_p12, %p1094_p11 }
  0x24   :  { %860 = vmatprep.subr.mxu1 %v1119_v0  ;;  %917 = vmatprep.subr.mxu0 %v499_v11  ;;  %v254_v24 = vld [vmem:[%s1386_s1 + $0x40] sm:$0xff]  ;;  %v255_v25 = vld [vmem:[%s1386_s1 + $0x48] sm:$0xff]  ;;  %v256_v26 = vld [vmem:[%s1386_s1 + $0x50] sm:$0xff] }
  0x25   :  { %861 = vmatpush3.msra.mxu1 %v166_v10  ;;  %v257_v27 = vld [vmem:[%s1386_s1 + $0x58] sm:$0xff]  ;;  %v258_v28 = vld [vmem:[%s1386_s1 + $0x60] sm:$0xff]  ;;  %v259_v29 = vld [vmem:[%s1386_s1 + $0x68] sm:$0xff]  ;;  %p1097_p0 = pnand %p1096_p13, %p1090_p10 }
  0x26   :  { %894 = vmatmul.mubr.msk.f32.vlgmr.msra.gmra.mxu0 %vm270_vm3, %v247_v6  ;;  %862 = vmatprep.subr.mxu1 %v1119_v0  ;;  %v260_v30 = vld [vmem:[%s1386_s1 + $0x70] sm:$0xff]  ;;  %v261_v31 = vld [vmem:[%s1386_s1 + $0x78] sm:$0xff]  ;;  %v161_v32 = vld [vmem:[%s1389_s4 + $0x40] sm:$0xff] }
  0x27   :  { %896 = vmatprep.mubr.msk.f32.mxu0 %vm270_vm3, %v248_v7  ;;  %918 = vmatpush3.msra.mxu0 %v499_v11  ;;  %v495_v33 = vld [vmem:[#allocation6 + $0x58] sm:$0xff]  ;;  %v160_v34 = vld [vmem:[%s1389_s4 + $0x38] sm:$0xff]  ;;  %v494_v35 = vld [vmem:[#allocation6 + $0x50] sm:$0xff] }
  0x28   :  { %863 = vmatpush3.msra.mxu1 %v165_v14  ;;  %919 = vmatprep.subr.mxu0 %v498_v15  ;;  %v159_v36 = vld [vmem:[%s1389_s4 + $0x30] sm:$0xff]  ;;  %v493_v37 = vld [vmem:[#allocation6 + $0x48] sm:$0xff]  ;;  %v158_v38 = vld [vmem:[%s1389_s4 + $0x28] sm:$0xff] }
  0x29   :  { %864 = vmatprep.subr.mxu1 %v1119_v0  ;;  %920 = vmatpush3.msra.mxu0 %v498_v15  ;;  %v492_v39 = vld [vmem:[#allocation6 + $0x40] sm:$0xff]  ;;  %v157_v40 = vld [vmem:[%s1389_s4 + $0x20] sm:$0xff]  ;;  %v491_v41 = vld [vmem:[#allocation6 + $0x38] sm:$0xff] }
  0x2a   :  { %897 = vmatmul.mubr.msk.f32.gmra.mxu0 %vm270_vm3, %v249_v12  ;;  %865 = vmatpush3.msra.mxu1 %v164_v16  ;;  %v156_v42 = vld [vmem:[%s1389_s4 + $0x18] sm:$0xff]  ;;  %v490_v43 = vld [vmem:[#allocation6 + $0x30] sm:$0xff]  ;;  %v155_v44 = vld [vmem:[%s1389_s4 + $0x10] sm:$0xff] }
  0x2b   :  { %899 = vmatprep.mubr.msk.f32.mxu0 %vm270_vm3, %v250_v13  ;;  %866 = vmatprep.subr.mxu1 %v1119_v0  ;;  %v489_v45 = vld [vmem:[#allocation6 + $0x28] sm:$0xff]  ;;  %v154_v46 = vld [vmem:[%s1389_s4 + $0x8] sm:$0xff]  ;;  %v488_v47 = vld [vmem:[#allocation6 + $0x20] sm:$0xff] }
  0x2c   :  { %867 = vmatpush3.msra.mxu1 %v163_v19  ;;  %921 = vmatprep.subr.mxu0 %v497_v20  ;;  %v153_v48 = vld [vmem:[%s1389_s4] sm:$0xff]  ;;  %v487_v49 = vld [vmem:[#allocation6 + $0x18] sm:$0xff]  ;;  %v485_v51 = vld [vmem:[#allocation6 + $0x8] sm:$0xff] }
  0x2d   :  { %868 = vmatprep.subr.mxu1 %v1119_v0  ;;  %922 = vmatpush3.msra.mxu0 %v497_v20  ;;  %v486_v50 = vld [vmem:[#allocation6 + $0x10] sm:$0xff]  ;;  %v484_v52 = vld [vmem:[#allocation6] sm:$0xff] }
  0x2e   :  { %900 = vmatmul.mubr.msk.f32.gmra.mxu0 %vm270_vm3, %v251_v17  ;;  %869 = vmatpush3.msra.mxu1 %v162_v21  ;;  %v741_v53 = vld [vmem:[%s1388_s3] ss:$0 sm:$0xff] }
  0x2f   :  { %902 = vmatprep.mubr.msk.f32.mxu0 %vm270_vm3, %v252_v18  ;;  %923 = vmatprep.subr.mxu0 %v496_v23  ;;  %v1335_v57 = vld [vmem:[%s1392_s7] ss:$0 sm:$0xff] }
  0x30   :  { %870 = vmatprep.subr.mxu1 %v1119_v0  ;;  %924 = vmatpush3.msra.mxu0 %v496_v23 }
  0x31   :  { %871 = vmatpush3.msra.mxu1 %v161_v32  ;;  %925 = vmatprep.subr.mxu0 %v495_v33 }
  0x32   :  { %903 = vmatmul.mubr.msk.f32.gmra.mxu0 %vm270_vm3, %v253_v22  ;;  %872 = vmatprep.subr.mxu1 %v1119_v0 }
  0x33   :  { %905 = vmatprep.mubr.msk.f32.mxu0 %vm270_vm3, %v254_v24  ;;  %926 = vmatpush3.msra.mxu0 %v495_v33 }
  0x34   :  { %873 = vmatpush3.msra.mxu1 %v160_v34  ;;  %927 = vmatprep.subr.mxu0 %v494_v35 }
  0x35   :  { %874 = vmatprep.subr.mxu1 %v1119_v0  ;;  %928 = vmatpush3.msra.mxu0 %v494_v35 }
  0x36   :  { %906 = vmatmul.mubr.msk.f32.gmra.mxu0 %vm270_vm3, %v255_v25  ;;  %875 = vmatpush3.msra.mxu1 %v159_v36 }
  0x37   :  { %908 = vmatprep.mubr.msk.f32.mxu0 %vm270_vm3, %v256_v26  ;;  %929 = vmatprep.subr.mxu0 %v493_v37 }
  0x38   :  { %876 = vmatprep.subr.mxu1 %v1119_v0  ;;  %930 = vmatpush3.msra.mxu0 %v493_v37 }
  0x39   :  { %877 = vmatpush3.msra.mxu1 %v158_v38  ;;  %931 = vmatprep.subr.mxu0 %v492_v39 }
  0x3a   :  { %909 = vmatmul.mubr.msk.f32.gmra.mxu0 %vm270_vm3, %v257_v27  ;;  %878 = vmatprep.subr.mxu1 %v1119_v0 }
  0x3b   :  { %911 = vmatprep.mubr.msk.f32.mxu0 %vm270_vm3, %v258_v28  ;;  %932 = vmatpush3.msra.mxu0 %v492_v39 }
  0x3c   :  { %879 = vmatpush3.msra.mxu1 %v157_v40  ;;  %933 = vmatprep.subr.mxu0 %v491_v41 }
  0x3d   :  { %880 = vmatprep.subr.mxu1 %v1119_v0  ;;  %934 = vmatpush3.msra.mxu0 %v491_v41 }
  0x3e   :  { %912 = vmatmul.mubr.msk.f32.gmra.mxu0 %vm270_vm3, %v259_v29  ;;  %881 = vmatpush3.msra.mxu1 %v156_v42 }
  0x3f   :  { %914 = vmatprep.mubr.msk.f32.mxu0 %vm270_vm3, %v260_v30  ;;  %935 = vmatprep.subr.mxu0 %v490_v43 }
  0x40   :  { %882 = vmatprep.subr.mxu1 %v1119_v0  ;;  %936 = vmatpush3.msra.mxu0 %v490_v43 }
  0x41   :  { %883 = vmatpush3.msra.mxu1 %v155_v44  ;;  %937 = vmatprep.subr.mxu0 %v489_v45 }
  0x42   :  { %915 = vmatmul.mubr.msk.f32.gmra.mxu0 %vm270_vm3, %v261_v31  ;;  %884 = vmatprep.subr.mxu1 %v1119_v0 }
  0x43   :  { %938 = vmatpush3.msra.mxu0 %v489_v45  ;;  %885 = vmatpush3.msra.mxu1 %v154_v46 }
  0x44   :  { %939 = vmatprep.subr.mxu0 %v488_v47  ;;  %886 = vmatprep.subr.mxu1 %v1119_v0 }
  0x45   :  { %940 = vmatpush3.msra.mxu0 %v488_v47  ;;  %887 = vmatpush3.msra.mxu1 %v153_v48 }
  0x46   :  { %941 = vmatprep.subr.mxu0 %v487_v49  ;;  %973 = vmatprep.subr.mxu1 %v1119_v0 }
  0x47   :  { %942 = vmatpush3.msra.mxu0 %v487_v49 }
  0x48   :  { %943 = vmatprep.subr.mxu0 %v486_v50 }
  0x49   :  { %944 = vmatpush3.msra.mxu0 %v486_v50 }
  0x4a   :  { %945 = vmatprep.subr.mxu0 %v485_v51 }
  0x4b   :  { %946 = vmatpush3.msra.mxu0 %v485_v51 }
  0x4c   :  { %947 = vmatprep.subr.mxu0 %v484_v52 }
  0x4d   :  { %948 = vmatpush3.msra.mxu0 %v484_v52 }
  0xe2   :  { %v148_v54 = vpop.f32.mrf.mxu0 }
  0xe3   :  { %v149_v55 = vadd.f32 %v741_v53, %v148_v54 }
  0xe4   :  { %v855_v56 = vpop.f32.mrf.mxu0 }
  0xe5   :  { %1015 = vtanh.f32 %v149_v55 }
  0xe6   :  { %v895_v58 = vpop.f32.mrf.mxu0 }
  0xe7   :  { %v395_v59 = vadd.f32 %v895_v58, %v1335_v57 }
  0xe8   :  { %v389_v60 = vpop.f32.mrf.mxu0 }
  0xe9   :  { %v390_v61 = vadd.f32 %v1335_v57, %v389_v60  ;;  %v762_v60 = vld [vmem:[%s1394_s9] ss:$0 sm:$0xff] }
  0xea   :  { %v898_v62 = vpop.f32.mrf.mxu0 }
  0xeb   :  { %1017 = vtanh.f32 %v390_v61  ;;  %v405_v63 = vadd.f32 %v898_v62, %v1335_v57 }
  0xec   :  { %1019 = vtanh.f32 %v395_v59  ;;  %v399_v1 = vpop.f32.mrf.mxu0 }
  0xed   :  { %v400_v2 = vadd.f32 %v1335_v57, %v399_v1 }
  0xee   :  { %v901_v3 = vpop.f32.mrf.mxu0 }
  0xef   :  { %1021 = vtanh.f32 %v400_v2  ;;  %v415_v4 = vadd.f32 %v901_v3, %v1335_v57 }
  0xf0   :  { %1023 = vtanh.f32 %v405_v63  ;;  %v409_v5 = vpop.f32.mrf.mxu0 }
  0xf1   :  { %v410_v6 = vadd.f32 %v1335_v57, %v409_v5 }
  0xf2   :  { %v1016_v7 = vpop.eup %1015  ;;  %v904_v8 = vpop.f32.mrf.mxu0 }
  0xf3   :  { %1025 = vtanh.f32 %v410_v6  ;;  %889 = vmatmul.mubr.f32.vlgmr.msra.gmra.mxu1 %v1016_v7  ;;  %v425_v9 = vadd.f32 %v904_v8, %v1335_v57 }
  0xf4   :  { %1027 = vtanh.f32 %v415_v4  ;;  %v419_v10 = vpop.f32.mrf.mxu0  ;;  %1005 = vmatprep.mubr.msk.f32.mxu1 %vm1120_vm0, %v1119_v0 }
  0xf5   :  { %v420_v11 = vadd.f32 %v1335_v57, %v419_v10 }
  0xf6   :  { %v907_v12 = vpop.f32.mrf.mxu0 }
  0xf7   :  { %1029 = vtanh.f32 %v420_v11  ;;  %v435_v14 = vadd.f32 %v907_v12, %v1335_v57 }
  0xf8   :  { %v1018_v13 = vpop.eup %1017  ;;  %1031 = vtanh.f32 %v425_v9  ;;  %v429_v15 = vpop.f32.mrf.mxu0 }
  0xf9   :  { %v1020_v16 = vpop.eup %1019  ;;  %v430_v17 = vadd.f32 %v1335_v57, %v429_v15  ;;  %949 = vmatprep.mubr.f32.mxu0 %v1018_v13  ;;  %v743_v15 = vld [vmem:[%s1390_s5] ss:$0 sm:$0xff] }
  0xfa   :  { %v910_v18 = vpop.f32.mrf.mxu0  ;;  %950 = vmatmul.mubr.f32.vlgmr.msra.gmra.mxu0 %v1020_v16 }
  0xfb   :  { %1033 = vtanh.f32 %v430_v17  ;;  %v445_v20 = vadd.f32 %v910_v18, %v1335_v57  ;;  %v653_v18 = vstv %s1395_s10 }
  0xfc   :  { %v1022_v19 = vpop.eup %1021  ;;  %1035 = vtanh.f32 %v435_v14  ;;  %v439_v21 = vpop.f32.mrf.mxu0 }
  0xfd   :  { %v1024_v22 = vpop.eup %1023  ;;  %v440_v23 = vadd.f32 %v1335_v57, %v439_v21  ;;  %952 = vmatprep.mubr.f32.mxu0 %v1022_v19 }
  0xfe   :  { %v913_v24 = vpop.f32.mrf.mxu0  ;;  %953 = vmatmul.mubr.f32.gmra.mxu0 %v1024_v22 }
  0xff   :  { %1037 = vtanh.f32 %v440_v23  ;;  %v455_v26 = vadd.f32 %v913_v24, %v1335_v57 }
 0x100   :  { %v1026_v25 = vpop.eup %1025  ;;  %1039 = vtanh.f32 %v445_v20  ;;  %v449_v27 = vpop.f32.mrf.mxu0 }
 0x101   :  { %v1028_v28 = vpop.eup %1027  ;;  %v450_v29 = vadd.f32 %v1335_v57, %v449_v27  ;;  %955 = vmatprep.mubr.f32.mxu0 %v1026_v25 }
 0x102   :  { %v916_v30 = vpop.f32.mrf.mxu0  ;;  %956 = vmatmul.mubr.f32.gmra.mxu0 %v1028_v28 }
 0x103   :  { %1041 = vtanh.f32 %v450_v29  ;;  %v465_v32 = vadd.f32 %v916_v30, %v1335_v57 }
 0x104   :  { %v1030_v31 = vpop.eup %1029  ;;  %1043 = vtanh.f32 %v455_v26  ;;  %v459_v33 = vpop.f32.mrf.mxu0 }
 0x105   :  { %v1032_v34 = vpop.eup %1031  ;;  %v460_v35 = vadd.f32 %v1335_v57, %v459_v33  ;;  %958 = vmatprep.mubr.f32.mxu0 %v1030_v31 }
 0x106   :  { %959 = vmatmul.mubr.f32.gmra.mxu0 %v1032_v34 }
 0x107   :  { %1045 = vtanh.f32 %v460_v35 }
 0x108   :  { %v1034_v36 = vpop.eup %1033  ;;  %1047 = vtanh.f32 %v465_v32 }
 0x109   :  { %v1036_v37 = vpop.eup %1035  ;;  %961 = vmatprep.mubr.f32.mxu0 %v1034_v36 }
 0x10a   :  { %962 = vmatmul.mubr.f32.gmra.mxu0 %v1036_v37 }
 0x10c   :  { %v1038_v38 = vpop.eup %1037 }
 0x10d   :  { %v1040_v39 = vpop.eup %1039  ;;  %964 = vmatprep.mubr.f32.mxu0 %v1038_v38 }
 0x10e   :  { %965 = vmatmul.mubr.f32.gmra.mxu0 %v1040_v39 }
 0x110   :  { %v1042_v40 = vpop.eup %1041 }
 0x111   :  { %v1044_v41 = vpop.eup %1043  ;;  %967 = vmatprep.mubr.f32.mxu0 %v1042_v40 }
 0x112   :  { %968 = vmatmul.mubr.f32.gmra.mxu0 %v1044_v41 }
 0x114   :  { %v1046_v42 = vpop.eup %1045 }
 0x115   :  { %v1048_v43 = vpop.eup %1047  ;;  %970 = vmatprep.mubr.f32.mxu0 %v1046_v42 }
 0x116   :  { %971 = vmatmul.mubr.f32.gmra.mxu0 %v1048_v43 }
 0x1b3   :  { %v1355_v44 = vpop.f32.mrf.mxu1 }
 0x1b4   :  { %v243_v17 = vadd.f32 %v743_v15, %v1355_v44 }
 0x1b5   :  { %v890_v45 = vpop.f32.mrf.mxu1 }
 0x1ba   :  { %v951_v46 = vpop.f32.mrf.mxu0 }
 0x1bb   :  { %v579_v14 = vadd.f32 %v951_v46, %v762_v60 }
 0x1bc   :  { %v573_v47 = vpop.f32.mrf.mxu0 }
 0x1bd   :  { %v574_v16 = vadd.f32 %v762_v60, %v573_v47 }
 0x1be   :  { %v954_v48 = vpop.f32.mrf.mxu0 }
 0x1bf   :  { %v589_v12 = vadd.f32 %v954_v48, %v762_v60 }
 0x1c0   :  { %v583_v49 = vpop.f32.mrf.mxu0 }
 0x1c1   :  { %v584_v13 = vadd.f32 %v762_v60, %v583_v49 }
 0x1c2   :  { %v957_v50 = vpop.f32.mrf.mxu0 }
 0x1c3   :  { %v599_v10 = vadd.f32 %v957_v50, %v762_v60 }
 0x1c4   :  { %v593_v51 = vpop.f32.mrf.mxu0 }
 0x1c5   :  { %v594_v11 = vadd.f32 %v762_v60, %v593_v51 }
 0x1c6   :  { %v960_v52 = vpop.f32.mrf.mxu0 }
 0x1c7   :  { %v609_v8 = vadd.f32 %v960_v52, %v762_v60 }
 0x1c8   :  { %v603_v53 = vpop.f32.mrf.mxu0 }
 0x1c9   :  { %v604_v9 = vadd.f32 %v762_v60, %v603_v53 }
 0x1ca   :  { %v963_v54 = vpop.f32.mrf.mxu0 }
 0x1cb   :  { %v619_v6 = vadd.f32 %v963_v54, %v762_v60 }
 0x1cc   :  { %v613_v55 = vpop.f32.mrf.mxu0 }
 0x1cd   :  { %v614_v7 = vadd.f32 %v762_v60, %v613_v55 }
 0x1ce   :  { %v966_v56 = vpop.f32.mrf.mxu0 }
 0x1cf   :  { %v629_v4 = vadd.f32 %v966_v56, %v762_v60 }
 0x1d0   :  { %v623_v57 = vpop.f32.mrf.mxu0 }
 0x1d1   :  { %v624_v5 = vadd.f32 %v762_v60, %v623_v57 }
 0x1d2   :  { %v969_v58 = vpop.f32.mrf.mxu0 }
 0x1d3   :  { %v639_v2 = vadd.f32 %v969_v58, %v762_v60 }
 0x1d4   :  { %v633_v59 = vpop.f32.mrf.mxu0 }
 0x1d5   :  { %v634_v3 = vadd.f32 %v762_v60, %v633_v59 }
 0x1d6   :  { %v972_v61 = vpop.f32.mrf.mxu0 }
 0x1d7   :  { %v649_v62 = vadd.f32 %v972_v61, %v762_v60 }
 0x1d8   :  { %v643_v63 = vpop.f32.mrf.mxu0 }
 0x1d9   :  { %974 = vmatpush3.xpose.msra.mxu1 %v649_v62  ;;  %v644_v1 = vadd.f32 %v762_v60, %v643_v63 }
 0x1da   :  { %975 = vmatprep.subr.mxu1 %v1119_v0 }
 0x1dd   :  { %976 = vmatpush3.xpose.msra.mxu1 %v644_v1 }
 0x1de   :  { %977 = vmatprep.subr.mxu1 %v1119_v0 }
 0x1e1   :  { %978 = vmatpush3.xpose.msra.mxu1 %v639_v2 }
 0x1e2   :  { %979 = vmatprep.subr.mxu1 %v1119_v0 }
 0x1e5   :  { %980 = vmatpush3.xpose.msra.mxu1 %v634_v3 }
 0x1e6   :  { %981 = vmatprep.subr.mxu1 %v1119_v0 }
 0x1e9   :  { %982 = vmatpush3.xpose.msra.mxu1 %v629_v4 }
 0x1ea   :  { %983 = vmatprep.subr.mxu1 %v1119_v0 }
 0x1ed   :  { %984 = vmatpush3.xpose.msra.mxu1 %v624_v5 }
 0x1ee   :  { %985 = vmatprep.subr.mxu1 %v1119_v0 }
 0x1f1   :  { %986 = vmatpush3.xpose.msra.mxu1 %v619_v6 }
 0x1f2   :  { %987 = vmatprep.subr.mxu1 %v1119_v0 }
 0x1f5   :  { %988 = vmatpush3.xpose.msra.mxu1 %v614_v7 }
 0x1f6   :  { %989 = vmatprep.subr.mxu1 %v1119_v0 }
 0x1f9   :  { %990 = vmatpush3.xpose.msra.mxu1 %v609_v8 }
 0x1fa   :  { %991 = vmatprep.subr.mxu1 %v1119_v0 }
 0x1fd   :  { %992 = vmatpush3.xpose.msra.mxu1 %v604_v9 }
 0x1fe   :  { %993 = vmatprep.subr.mxu1 %v1119_v0 }
 0x201   :  { %994 = vmatpush3.xpose.msra.mxu1 %v599_v10 }
 0x202   :  { %995 = vmatprep.subr.mxu1 %v1119_v0 }
 0x205   :  { %996 = vmatpush3.xpose.msra.mxu1 %v594_v11 }
 0x206   :  { %997 = vmatprep.subr.mxu1 %v1119_v0 }
 0x209   :  { %998 = vmatpush3.xpose.msra.mxu1 %v589_v12 }
 0x20a   :  { %999 = vmatprep.subr.mxu1 %v1119_v0 }
 0x20d   :  { %1000 = vmatpush3.xpose.msra.mxu1 %v584_v13 }
 0x20e   :  { %1001 = vmatprep.subr.mxu1 %v1119_v0 }
 0x211   :  { %1002 = vmatpush3.xpose.msra.mxu1 %v579_v14 }
 0x212   :  { %1003 = vmatprep.subr.mxu1 %v1119_v0 }
 0x215   :  { %1004 = vmatpush3.xpose.msra.mxu1 %v574_v16 }
 0x218   :  { %1006 = vmatmul.mubr.f32.vlgmr.msra.gmra.mxu1 %v243_v17 }
 0x2d8   :  { %v720_v19 = vpop.f32.mrf.mxu1 }
 0x2d9   :  { %v721_v20 = vadd.f32 %v720_v19, %v653_v18 }
 0x2da   :  { %v1007_v21 = vpop.f32.mrf.mxu1 }
 0x2db   :  { %724 = vst [vmem:[#allocation8] sm:$0xff] %v721_v20 }
 0x2dc   :  { %1100 = shalt.err (!%p1097_p0)
}
 0x2dd   :  { %734 = dma.vmem_to_hbm [thread:$0]  %s732_s13, 128, %s1396_s11, [#allocation5]  }
 0x2de   :  { %1113 = dma.done.wait [#allocation5], 128  }
 0x2df   :  { %1114 = vsyncadd [#allocation5], 4294967168 }
 0x2e0   :  { %738 = vsyncpa [#allocation4], 1 }
 0x2e1   :  { %739 = vsyncpa [#allocation7], 1 }
 0x2e2   :  { %740 = vsyncpa [#allocation5], 1 }

</bundles_post_ra>
